<compile_context>
chip_gen: v5e
topology: v5e:2x2
jax: 0.10.0
libtpu: 0.0.40
codegen_flags: <defaults>
</compile_context>

<pallas_src>
import functools

import jax
import jax.numpy as jnp
import numpy as np
from jax import lax
from jax.experimental import pallas as pl
from jax.experimental.pallas import tpu as pltpu


# ----------------------------------------------------------------------------
# Kernel
# ----------------------------------------------------------------------------
def _mha_kernel(q_ref, kp_ref, vp_ref, wq_ref, bq_ref, wfc_ref, bfc_ref,
                gamma_ref, beta_ref, *out_refs,
                n_head, eps, emit_attn, compute_dtype, exact_recip):
    out_ref = out_refs[0]
    attn_ref = out_refs[1] if emit_attn else None

    qb = q_ref[0]                        # (tq, d_model) f32 (kept for residual)
    qc = qb.astype(compute_dtype)        # matmul operand dtype (bf16 or f32)

    def head_body(h, o_acc):
        # Per-head Q projection (1/temperature already folded into wq/bq).
        Qh = (jnp.dot(qc, wq_ref[h], preferred_element_type=jnp.float32)
              + bq_ref[h])                                         # (tq, d_k) f32
        Kh = kp_ref[h]                                             # (n_k, d_k)
        Vh = vp_ref[h]                                             # (n_k, d_v)

        # Q @ K^T without materializing a transpose (NT matmul on the MXU).
        s = lax.dot_general(Qh.astype(compute_dtype), Kh,
                            dimension_numbers=(((1,), (1,)), ((), ())),
                            preferred_element_type=jnp.float32)    # (tq, n_k)
        s = s - jnp.max(s, axis=-1, keepdims=True)                 # stable softmax
        p = jnp.exp(s)
        denom = jnp.sum(p, axis=-1, keepdims=True)
        if exact_recip:
            a = p * pl.reciprocal(denom)
        else:
            a = p * pl.reciprocal(denom, approx=True)              # EUP slot

        if emit_attn:
            attn_ref[h] = a.reshape(1, *a.shape).astype(attn_ref.dtype)

        ho = jnp.dot(a.astype(compute_dtype), Vh,
                     preferred_element_type=jnp.float32)           # (tq, d_v)
        # Per-head slice of the fc projection, accumulated in f32 — avoids the
        # (tq, n_head*d_v) concat and its lane-offset stores.
        return o_acc + jnp.dot(ho.astype(compute_dtype), wfc_ref[h],
                               preferred_element_type=jnp.float32)

    o = lax.fori_loop(0, n_head, head_body,
                      jnp.zeros(qb.shape, jnp.float32), unroll=True)
    o = o + bfc_ref[0]

    # residual + LayerNorm(d_model); dropouts are identity in eval mode.
    x = o + qb
    mu = jnp.mean(x, axis=-1, keepdims=True)
    var = jnp.mean((x - mu) ** 2, axis=-1, keepdims=True)
    y = (x - mu) * lax.rsqrt(var + eps)
    out_ref[0] = (y * gamma_ref[0] + beta_ref[0]).astype(out_ref.dtype)


# ----------------------------------------------------------------------------
# VMEM budgeting helpers (generation-aware)
# ----------------------------------------------------------------------------
def _vmem_capacity_bytes():
    try:
        return int(pltpu.get_tpu_info().vmem_capacity_bytes)
    except Exception:
        return 64 * 1024 * 1024          # conservative (v7x per-core VMEM)


def _tile_vmem_bytes(tq, *, n_k, d_model, n_head, d_k, d_v, esize, emit_attn):
    dbl = 2                                                # double-buffered blocks
    b = dbl * tq * d_model * 4                             # q block (f32)
    b += dbl * n_head * n_k * (d_k + d_v) * esize          # projected K/V blocks
    b += dbl * tq * d_model * 4                            # output block
    if emit_attn:
        b += dbl * n_head * tq * n_k * 4                   # attention-prob block
    b += dbl * n_head * (d_model * d_k + d_v * d_model) * esize   # wq, wfc
    b += dbl * (n_head * d_k + 3 * d_model) * 4                   # biases, LN params
    b += 8 * tq * max(n_k, d_model) * 4                    # in-kernel temporaries
    return b


def _pick_q_tile(n_q, fits):
    """Largest multiple-of-8 divisor of n_q fitting the VMEM budget, preferring
    MXU-friendly multiples of 256 / 128."""
    if n_q <= 8 or n_q % 8:
        return n_q
    divs = [t for t in range(8, n_q + 1, 8) if n_q % t == 0]
    ok = [t for t in divs if fits(t)]
    if not ok:
        return divs[0]
    for align in (256, 128):
        aligned = [t for t in ok if t % align == 0]
        if aligned:
            return max(aligned)
    return max(ok)


# ----------------------------------------------------------------------------
# Wrapper
# ----------------------------------------------------------------------------
def multi_head_attention(q, k, v, params, *, n_head, d_k, d_v,
                         q_tile=None, use_bf16=True, return_attn=True):
    bs, n_q, d_model = q.shape
    _, n_k, _ = k.shape
    inv_temperature = float(1.0 / np.power(d_k, 0.5))
    compute_dtype = jnp.bfloat16 if use_bf16 else jnp.float32
    esize = 2 if use_bf16 else 4

    wq_t, bq, wk_t, bk, wv_t, bv, wfc_t, bfc, gamma, beta = params

    # Hoisted K/V projections: one batched XLA matmul over bs*n_k rows, then
    # repacked head-major so the kernel only does leading-dim indexing.
    kp = (k @ wk_t + bk[0]).reshape(bs, n_k, n_head, d_k)
    kp = kp.transpose(0, 2, 1, 3).reshape(bs * n_head, n_k, d_k).astype(compute_dtype)
    vp = (v @ wv_t + bv[0]).reshape(bs, n_k, n_head, d_v)
    vp = vp.transpose(0, 2, 1, 3).reshape(bs * n_head, n_k, d_v).astype(compute_dtype)

    # Head-major Q / fc weights; fold 1/temperature into the Q projection
    # (exact when temperature is a power of two, e.g. d_k = 16).
    wq_h = (wq_t.reshape(d_model, n_head, d_k).transpose(1, 0, 2)
            * inv_temperature).astype(compute_dtype)                 # (H, dm, dk)
    bq_h = (bq.reshape(n_head, 1, d_k) * inv_temperature).astype(jnp.float32)
    wfc_h = wfc_t.reshape(n_head, d_v, d_model).astype(compute_dtype)  # (H, dv, dm)
    bfc_f = bfc.astype(jnp.float32)
    gamma_f = gamma.astype(jnp.float32)
    beta_f = beta.astype(jnp.float32)

    # Generation-aware VMEM budget and q-tile choice.
    cap = _vmem_capacity_bytes()
    budget = int(0.80 * cap)

    def tile_bytes(t):
        return _tile_vmem_bytes(t, n_k=n_k, d_model=d_model, n_head=n_head,
                                d_k=d_k, d_v=d_v, esize=esize,
                                emit_attn=return_attn)

    tq = q_tile if q_tile is not None else _pick_q_tile(
        n_q, lambda t: tile_bytes(t) <= budget)
    assert n_q % tq == 0, "q_tile must divide n_q"
    n_qt = n_q // tq

    need = tile_bytes(tq)
    vmem_limit = int(min(max(2 * need, 32 << 20), int(0.85 * cap)))
    vmem_limit = int(min(max(vmem_limit, need + (4 << 20)), cap))

    # Advisory cost estimate (kernel-side work only; K/V projections are hoisted).
    flops = (2 * bs * n_q * d_model * n_head * d_k            # Q projection
             + 2 * bs * n_head * n_q * n_k * (d_k + d_v)      # QK^T + A@V
             + 2 * bs * n_q * n_head * d_v * d_model)         # fc
    transcendentals = bs * n_head * n_q * n_k
    bytes_accessed = (q.size * 4 + (kp.size + vp.size) * esize
                      + (wq_h.size + wfc_h.size) * esize
                      + (bq_h.size + bfc_f.size + gamma_f.size + beta_f.size) * 4
                      + bs * n_q * d_model * 4
                      + (n_head * bs * n_q * n_k * 4 if return_attn else 0))
    cost = pl.CostEstimate(flops=int(flops), transcendentals=int(transcendentals),
                           bytes_accessed=int(bytes_accessed))

    kernel = functools.partial(_mha_kernel, n_head=n_head, eps=1e-5,
                               emit_attn=return_attn, compute_dtype=compute_dtype,
                               exact_recip=not use_bf16)

    def const_spec(shape):
        return pl.BlockSpec(shape, lambda b, t: (0,) * len(shape))

    in_specs = [
        pl.BlockSpec((1, tq, d_model), lambda b, t: (b, t, 0)),       # q tile
        pl.BlockSpec((n_head, n_k, d_k), lambda b, t: (b, 0, 0)),     # K proj (head-major)
        pl.BlockSpec((n_head, n_k, d_v), lambda b, t: (b, 0, 0)),     # V proj (head-major)
        const_spec(wq_h.shape), const_spec(bq_h.shape),
        const_spec(wfc_h.shape), const_spec(bfc_f.shape),
        const_spec(gamma_f.shape), const_spec(beta_f.shape),
    ]

    out_block = pl.BlockSpec((1, tq, d_model), lambda b, t: (b, t, 0))
    if return_attn:
        out_shape = (jax.ShapeDtypeStruct((bs, n_q, d_model), jnp.float32),
                     jax.ShapeDtypeStruct((n_head, bs, n_q, n_k), jnp.float32))
        out_specs = [out_block,
                     pl.BlockSpec((n_head, 1, tq, n_k), lambda b, t: (0, b, t, 0))]
    else:
        out_shape = jax.ShapeDtypeStruct((bs, n_q, d_model), jnp.float32)
        out_specs = out_block

    fn = pl.pallas_call(
        kernel,
        out_shape=out_shape,
        grid_spec=pltpu.PrefetchScalarGridSpec(
            num_scalar_prefetch=0,
            grid=(bs, n_qt),
            in_specs=in_specs,
            out_specs=out_specs),
        compiler_params=pltpu.CompilerParams(
            dimension_semantics=("parallel", "parallel"),   # no cross-step state
            vmem_limit_bytes=vmem_limit),
        cost_estimate=cost,
    )

    results = fn(q.astype(jnp.float32), kp, vp, wq_h, bq_h, wfc_h,
                 bfc_f, gamma_f, beta_f)

    if return_attn:
        out, attn = results
        # torch convention: (n_head * bs, n_q, n_k), head-major — free reshape.
        return out, attn.reshape(n_head * bs, n_q, n_k)
    return results


# ----------------------------------------------------------------------------
# Pure-JAX reference mirroring the PyTorch forward (eval mode)
# ----------------------------------------------------------------------------
def reference_mha(q, k, v, params, *, n_head, d_k, d_v):
    wq_t, bq, wk_t, bk, wv_t, bv, wfc_t, bfc, gamma, beta = params
    bs, n_q, d_model = q.shape
    n_k = k.shape[1]
    temperature = np.power(d_k, 0.5)

    Q = q @ wq_t + bq[0]
    K = k @ wk_t + bk[0]
    V = v @ wv_t + bv[0]
    Qh = Q.reshape(bs, n_q, n_head, d_k).transpose(2, 0, 1, 3).reshape(-1, n_q, d_k)
    Kh = K.reshape(bs, n_k, n_head, d_k).transpose(2, 0, 1, 3).reshape(-1, n_k, d_k)
    Vh = V.reshape(bs, n_k, n_head, d_v).transpose(2, 0, 1, 3).reshape(-1, n_k, d_v)
    s = jnp.einsum('bqd,bkd->bqk', Qh, Kh) / temperature
    a = jax.nn.softmax(s, axis=2)
    o = jnp.einsum('bqk,bkd->bqd', a, Vh)
    o = o.reshape(n_head, bs, n_q, d_v).transpose(1, 2, 0, 3).reshape(bs, n_q, -1)
    o = o @ wfc_t + bfc[0]
    x = o + q
    mu = jnp.mean(x, axis=-1, keepdims=True)
    var = jnp.mean((x - mu) ** 2, axis=-1, keepdims=True)
    y = (x - mu) / jnp.sqrt(var + 1e-5)
    return y * gamma[0] + beta[0], a


def make_params(key, n_head, d_model, d_k, d_v):
    ks = jax.random.split(key, 8)
    std_qk = np.sqrt(2.0 / (d_model + d_k))
    std_v = np.sqrt(2.0 / (d_model + d_v))
    std_fc = np.sqrt(2.0 / (n_head * d_v + d_model))   # xavier_normal

    # weights stored pre-transposed: (in_features, out_features)
    wq_t = std_qk * jax.random.normal(ks[0], (d_model, n_head * d_k), jnp.float32)
    wk_t = std_qk * jax.random.normal(ks[1], (d_model, n_head * d_k), jnp.float32)
    wv_t = std_v * jax.random.normal(ks[2], (d_model, n_head * d_v), jnp.float32)
    wfc_t = std_fc * jax.random.normal(ks[3], (n_head * d_v, d_model), jnp.float32)

    lim = 1.0 / np.sqrt(d_model)
    bq = jax.random.uniform(ks[4], (1, n_head * d_k), jnp.float32, -lim, lim)
    bk = jax.random.uniform(ks[5], (1, n_head * d_k), jnp.float32, -lim, lim)
    bv = jax.random.uniform(ks[6], (1, n_head * d_v), jnp.float32, -lim, lim)
    lim_fc = 1.0 / np.sqrt(n_head * d_v)
    bfc = jax.random.uniform(ks[7], (1, d_model), jnp.float32, -lim_fc, lim_fc)

    gamma = jnp.ones((1, d_model), jnp.float32)
    beta = jnp.zeros((1, d_model), jnp.float32)
    return (wq_t, bq, wk_t, bk, wv_t, bv, wfc_t, bfc, gamma, beta)


if __name__ == "__main__":
    n_head, d_model, d_k, d_v = 2, 32, 16, 16
    bs, n_q, n_k = 2, 16, 8    # n_q=16 with q_tile=8 exercises the 2-tile path

    key = jax.random.PRNGKey(0)
    kq, kk, kv, kp_ = jax.random.split(key, 4)
    q = jax.random.normal(kq, (bs, n_q, d_model), jnp.float32)
    k = jax.random.normal(kk, (bs, n_k, d_model), jnp.float32)
    v = jax.random.normal(kv, (bs, n_k, d_model), jnp.float32)
    params = make_params(kp_, n_head, d_model, d_k, d_v)

    ref_out, ref_attn = reference_mha(q, k, v, params,
                                      n_head=n_head, d_k=d_k, d_v=d_v)

    # Exact f32 path (tight parity with the pure-JAX reference).
    out32, attn32 = multi_head_attention(q, k, v, params, n_head=n_head,
                                         d_k=d_k, d_v=d_v, q_tile=8,
                                         use_bf16=False)
    out32, attn32 = jax.block_until_ready((out32, attn32))
    np.testing.assert_allclose(np.asarray(out32), np.asarray(ref_out),
                               rtol=1e-5, atol=1e-5)
    np.testing.assert_allclose(np.asarray(attn32), np.asarray(ref_attn),
                               rtol=1e-5, atol=1e-5)

    # Fast path: bf16 MXU operands, f32 accumulation (loosened tolerance).
    out16, attn16 = multi_head_attention(q, k, v, params, n_head=n_head,
                                         d_k=d_k, d_v=d_v, use_bf16=True)
    out16, attn16 = jax.block_until_ready((out16, attn16))
    np.testing.assert_allclose(np.asarray(out16), np.asarray(ref_out),
                               rtol=5e-2, atol=5e-2)
    np.testing.assert_allclose(np.asarray(attn16), np.asarray(ref_attn),
                               rtol=5e-2, atol=5e-2)

    print("KERNEL_OK")
</pallas_src>

<mosaic_0001>
module attributes {stable_mosaic.version = 11 : i64} {
  func.func @_mha_kernel(%arg0: i32, %arg1: i32, %arg2: memref<1x8x32xf32, #tpu.memory_space<vmem>>, %arg3: memref<2x8x16xf32, #tpu.memory_space<vmem>>, %arg4: memref<2x8x16xf32, #tpu.memory_space<vmem>>, %arg5: memref<2x32x16xf32, #tpu.memory_space<vmem>>, %arg6: memref<2x1x16xf32, #tpu.memory_space<vmem>>, %arg7: memref<2x16x32xf32, #tpu.memory_space<vmem>>, %arg8: memref<1x32xf32, #tpu.memory_space<vmem>>, %arg9: memref<1x32xf32, #tpu.memory_space<vmem>>, %arg10: memref<1x32xf32, #tpu.memory_space<vmem>>, %arg11: memref<1x8x32xf32, #tpu.memory_space<vmem>>, %arg12: memref<2x1x8x8xf32, #tpu.memory_space<vmem>>) attributes {dimension_semantics = [#tpu.dimension_semantics<parallel>, #tpu.dimension_semantics<parallel>], iteration_bounds = array<i64: 2, 2>, scalar_prefetch = 0 : i64, scratch_operands = 0 : i64, tpu.core_type = #tpu.core_type<tc>, window_params = [{transform_indices = @transform_0, window_bounds = array<i64: 1, 8, 32>}, {transform_indices = @transform_1, window_bounds = array<i64: 2, 8, 16>}, {transform_indices = @transform_2, window_bounds = array<i64: 2, 8, 16>}, {pipeline_mode = #tpu.pipeline_mode<synchronous>, transform_indices = @transform_3, window_bounds = array<i64: 2, 32, 16>}, {pipeline_mode = #tpu.pipeline_mode<synchronous>, transform_indices = @transform_4, window_bounds = array<i64: 2, 1, 16>}, {pipeline_mode = #tpu.pipeline_mode<synchronous>, transform_indices = @transform_5, window_bounds = array<i64: 2, 16, 32>}, {pipeline_mode = #tpu.pipeline_mode<synchronous>, transform_indices = @transform_6, window_bounds = array<i64: 1, 32>}, {pipeline_mode = #tpu.pipeline_mode<synchronous>, transform_indices = @transform_7, window_bounds = array<i64: 1, 32>}, {pipeline_mode = #tpu.pipeline_mode<synchronous>, transform_indices = @transform_8, window_bounds = array<i64: 1, 32>}, {transform_indices = @transform_9, window_bounds = array<i64: 1, 8, 32>}, {transform_indices = @transform_10, window_bounds = array<i64: 2, 1, 8, 8>}]} {
    %c0 = arith.constant 0 : index
    %c0_0 = arith.constant 0 : index
    %c0_1 = arith.constant 0 : index
    %0 = vector.load %arg2[%c0, %c0_0, %c0_1] : memref<1x8x32xf32, #tpu.memory_space<vmem>>, vector<1x8x32xf32>
    %1 = vector.shape_cast %0 : vector<1x8x32xf32> to vector<8x32xf32>
    %cst = arith.constant 0.000000e+00 : f32
    %2 = vector.broadcast %cst : f32 to vector<8x32xf32>
    %c0_i32 = arith.constant 0 : i32
    %3 = arith.index_cast %c0_i32 : i32 to index
    %c0_2 = arith.constant 0 : index
    %c0_3 = arith.constant 0 : index
    %4 = vector.load %arg5[%3, %c0_2, %c0_3] : memref<2x32x16xf32, #tpu.memory_space<vmem>>, vector<1x32x16xf32>
    %5 = vector.shape_cast %4 : vector<1x32x16xf32> to vector<32x16xf32>
    %cst_4 = arith.constant dense<0.000000e+00> : vector<8x16xf32>
    %6 = tpu.matmul %1, %5, %cst_4 {dimension_numbers = #tpu.dot_dimension_numbers<[1], [0], [0], [1], [0, 0, 1, 1], [], []>} : vector<8x32xf32>, vector<32x16xf32>, vector<8x16xf32> -> vector<8x16xf32>
    %7 = arith.index_cast %c0_i32 : i32 to index
    %c0_5 = arith.constant 0 : index
    %c0_6 = arith.constant 0 : index
    %8 = vector.load %arg6[%7, %c0_5, %c0_6] : memref<2x1x16xf32, #tpu.memory_space<vmem>>, vector<1x1x16xf32>
    %9 = vector.shape_cast %8 : vector<1x1x16xf32> to vector<1x16xf32>
    %10 = vector.broadcast %9 : vector<1x16xf32> to vector<8x16xf32>
    %11 = arith.addf %6, %10 : vector<8x16xf32>
    %12 = arith.index_cast %c0_i32 : i32 to index
    %c0_7 = arith.constant 0 : index
    %c0_8 = arith.constant 0 : index
    %13 = vector.load %arg3[%12, %c0_7, %c0_8] : memref<2x8x16xf32, #tpu.memory_space<vmem>>, vector<1x8x16xf32>
    %14 = vector.shape_cast %13 : vector<1x8x16xf32> to vector<8x16xf32>
    %15 = arith.index_cast %c0_i32 : i32 to index
    %c0_9 = arith.constant 0 : index
    %c0_10 = arith.constant 0 : index
    %16 = vector.load %arg4[%15, %c0_9, %c0_10] : memref<2x8x16xf32, #tpu.memory_space<vmem>>, vector<1x8x16xf32>
    %17 = vector.shape_cast %16 : vector<1x8x16xf32> to vector<8x16xf32>
    %cst_11 = arith.constant dense<0.000000e+00> : vector<8x8xf32>
    %18 = tpu.matmul %11, %14, %cst_11 {dimension_numbers = #tpu.dot_dimension_numbers<[1], [1], [0], [0], [0, 0, 1, 0], [], []>} : vector<8x16xf32>, vector<8x16xf32>, vector<8x8xf32> -> vector<8x8xf32>
    %cst_12 = arith.constant dense<0xFF800000> : vector<8xf32>
    %19 = vector.multi_reduction <maximumf>, %18, %cst_12 [1] : vector<8x8xf32> to vector<8xf32>
    %20 = vector.shape_cast %19 : vector<8xf32> to vector<8x1xf32>
    %21 = vector.broadcast %20 : vector<8x1xf32> to vector<8x8xf32>
    %22 = arith.subf %18, %21 : vector<8x8xf32>
    %23 = math.exp %22 : vector<8x8xf32>
    %cst_13 = arith.constant dense<0.000000e+00> : vector<8xf32>
    %24 = vector.multi_reduction <add>, %23, %cst_13 [1] : vector<8x8xf32> to vector<8xf32>
    %25 = vector.shape_cast %24 : vector<8xf32> to vector<8x1xf32>
    %26 = tpu.reciprocal %25 : vector<8x1xf32> -> vector<8x1xf32>
    %27 = vector.broadcast %26 : vector<8x1xf32> to vector<8x8xf32>
    %28 = arith.mulf %23, %27 : vector<8x8xf32>
    %29 = vector.shape_cast %28 : vector<8x8xf32> to vector<1x8x8xf32>
    %30 = arith.index_cast %c0_i32 : i32 to index
    %c0_14 = arith.constant 0 : index
    %c0_15 = arith.constant 0 : index
    %c0_16 = arith.constant 0 : index
    %31 = vector.load %arg12[%30, %c0_14, %c0_15, %c0_16] : memref<2x1x8x8xf32, #tpu.memory_space<vmem>>, vector<1x1x8x8xf32>
    %32 = vector.shape_cast %31 : vector<1x1x8x8xf32> to vector<1x8x8xf32>
    %33 = vector.shape_cast %29 : vector<1x8x8xf32> to vector<1x1x8x8xf32>
    tpu.vector_store %arg12[%30, %c0_14, %c0_15, %c0_16], %33 {strides = array<i32>} : memref<2x1x8x8xf32, #tpu.memory_space<vmem>>, vector<1x1x8x8xf32>,
    %cst_17 = arith.constant dense<0.000000e+00> : vector<8x16xf32>
    %34 = tpu.matmul %28, %17, %cst_17 {dimension_numbers = #tpu.dot_dimension_numbers<[1], [0], [0], [1], [0, 0, 1, 1], [], []>} : vector<8x8xf32>, vector<8x16xf32>, vector<8x16xf32> -> vector<8x16xf32>
    %35 = arith.index_cast %c0_i32 : i32 to index
    %c0_18 = arith.constant 0 : index
    %c0_19 = arith.constant 0 : index
    %36 = vector.load %arg7[%35, %c0_18, %c0_19] : memref<2x16x32xf32, #tpu.memory_space<vmem>>, vector<1x16x32xf32>
    %37 = vector.shape_cast %36 : vector<1x16x32xf32> to vector<16x32xf32>
    %cst_20 = arith.constant dense<0.000000e+00> : vector<8x32xf32>
    %38 = tpu.matmul %34, %37, %cst_20 {dimension_numbers = #tpu.dot_dimension_numbers<[1], [0], [0], [1], [0, 0, 1, 1], [], []>} : vector<8x16xf32>, vector<16x32xf32>, vector<8x32xf32> -> vector<8x32xf32>
    %39 = arith.addf %2, %38 : vector<8x32xf32>
    %c1_i32 = arith.constant 1 : i32
    %40 = arith.index_cast %c1_i32 : i32 to index
    %c0_21 = arith.constant 0 : index
    %c0_22 = arith.constant 0 : index
    %41 = vector.load %arg5[%40, %c0_21, %c0_22] : memref<2x32x16xf32, #tpu.memory_space<vmem>>, vector<1x32x16xf32>
    %42 = vector.shape_cast %41 : vector<1x32x16xf32> to vector<32x16xf32>
    %cst_23 = arith.constant dense<0.000000e+00> : vector<8x16xf32>
    %43 = tpu.matmul %1, %42, %cst_23 {dimension_numbers = #tpu.dot_dimension_numbers<[1], [0], [0], [1], [0, 0, 1, 1], [], []>} : vector<8x32xf32>, vector<32x16xf32>, vector<8x16xf32> -> vector<8x16xf32>
    %44 = arith.index_cast %c1_i32 : i32 to index
    %c0_24 = arith.constant 0 : index
    %c0_25 = arith.constant 0 : index
    %45 = vector.load %arg6[%44, %c0_24, %c0_25] : memref<2x1x16xf32, #tpu.memory_space<vmem>>, vector<1x1x16xf32>
    %46 = vector.shape_cast %45 : vector<1x1x16xf32> to vector<1x16xf32>
    %47 = vector.broadcast %46 : vector<1x16xf32> to vector<8x16xf32>
    %48 = arith.addf %43, %47 : vector<8x16xf32>
    %49 = arith.index_cast %c1_i32 : i32 to index
    %c0_26 = arith.constant 0 : index
    %c0_27 = arith.constant 0 : index
    %50 = vector.load %arg3[%49, %c0_26, %c0_27] : memref<2x8x16xf32, #tpu.memory_space<vmem>>, vector<1x8x16xf32>
    %51 = vector.shape_cast %50 : vector<1x8x16xf32> to vector<8x16xf32>
    %52 = arith.index_cast %c1_i32 : i32 to index
    %c0_28 = arith.constant 0 : index
    %c0_29 = arith.constant 0 : index
    %53 = vector.load %arg4[%52, %c0_28, %c0_29] : memref<2x8x16xf32, #tpu.memory_space<vmem>>, vector<1x8x16xf32>
    %54 = vector.shape_cast %53 : vector<1x8x16xf32> to vector<8x16xf32>
    %cst_30 = arith.constant dense<0.000000e+00> : vector<8x8xf32>
    %55 = tpu.matmul %48, %51, %cst_30 {dimension_numbers = #tpu.dot_dimension_numbers<[1], [1], [0], [0], [0, 0, 1, 0], [], []>} : vector<8x16xf32>, vector<8x16xf32>, vector<8x8xf32> -> vector<8x8xf32>
    %cst_31 = arith.constant dense<0xFF800000> : vector<8xf32>
    %56 = vector.multi_reduction <maximumf>, %55, %cst_31 [1] : vector<8x8xf32> to vector<8xf32>
    %57 = vector.shape_cast %56 : vector<8xf32> to vector<8x1xf32>
    %58 = vector.broadcast %57 : vector<8x1xf32> to vector<8x8xf32>
    %59 = arith.subf %55, %58 : vector<8x8xf32>
    %60 = math.exp %59 : vector<8x8xf32>
    %cst_32 = arith.constant dense<0.000000e+00> : vector<8xf32>
    %61 = vector.multi_reduction <add>, %60, %cst_32 [1] : vector<8x8xf32> to vector<8xf32>
    %62 = vector.shape_cast %61 : vector<8xf32> to vector<8x1xf32>
    %63 = tpu.reciprocal %62 : vector<8x1xf32> -> vector<8x1xf32>
    %64 = vector.broadcast %63 : vector<8x1xf32> to vector<8x8xf32>
    %65 = arith.mulf %60, %64 : vector<8x8xf32>
    %66 = vector.shape_cast %65 : vector<8x8xf32> to vector<1x8x8xf32>
    %67 = arith.index_cast %c1_i32 : i32 to index
    %c0_33 = arith.constant 0 : index
    %c0_34 = arith.constant 0 : index
    %c0_35 = arith.constant 0 : index
    %68 = vector.load %arg12[%67, %c0_33, %c0_34, %c0_35] : memref<2x1x8x8xf32, #tpu.memory_space<vmem>>, vector<1x1x8x8xf32>
    %69 = vector.shape_cast %68 : vector<1x1x8x8xf32> to vector<1x8x8xf32>
    %70 = vector.shape_cast %66 : vector<1x8x8xf32> to vector<1x1x8x8xf32>
    tpu.vector_store %arg12[%67, %c0_33, %c0_34, %c0_35], %70 {strides = array<i32>} : memref<2x1x8x8xf32, #tpu.memory_space<vmem>>, vector<1x1x8x8xf32>,
    %cst_36 = arith.constant dense<0.000000e+00> : vector<8x16xf32>
    %71 = tpu.matmul %65, %54, %cst_36 {dimension_numbers = #tpu.dot_dimension_numbers<[1], [0], [0], [1], [0, 0, 1, 1], [], []>} : vector<8x8xf32>, vector<8x16xf32>, vector<8x16xf32> -> vector<8x16xf32>
    %72 = arith.index_cast %c1_i32 : i32 to index
    %c0_37 = arith.constant 0 : index
    %c0_38 = arith.constant 0 : index
    %73 = vector.load %arg7[%72, %c0_37, %c0_38] : memref<2x16x32xf32, #tpu.memory_space<vmem>>, vector<1x16x32xf32>
    %74 = vector.shape_cast %73 : vector<1x16x32xf32> to vector<16x32xf32>
    %cst_39 = arith.constant dense<0.000000e+00> : vector<8x32xf32>
    %75 = tpu.matmul %71, %74, %cst_39 {dimension_numbers = #tpu.dot_dimension_numbers<[1], [0], [0], [1], [0, 0, 1, 1], [], []>} : vector<8x16xf32>, vector<16x32xf32>, vector<8x32xf32> -> vector<8x32xf32>
    %76 = arith.addf %39, %75 : vector<8x32xf32>
    %c2_i32 = arith.constant 2 : i32
    %c0_40 = arith.constant 0 : index
    %c0_41 = arith.constant 0 : index
    %77 = vector.load %arg8[%c0_40, %c0_41] : memref<1x32xf32, #tpu.memory_space<vmem>>, vector<1x32xf32>
    %78 = vector.shape_cast %77 : vector<1x32xf32> to vector<32xf32>
    %79 = vector.shape_cast %78 : vector<32xf32> to vector<1x32xf32>
    %80 = vector.broadcast %79 : vector<1x32xf32> to vector<8x32xf32>
    %81 = arith.addf %76, %80 : vector<8x32xf32>
    %82 = arith.addf %81, %1 : vector<8x32xf32>
    %cst_42 = arith.constant dense<0.000000e+00> : vector<8xf32>
    %83 = vector.multi_reduction <add>, %82, %cst_42 [1] : vector<8x32xf32> to vector<8xf32>
    %84 = vector.shape_cast %83 : vector<8xf32> to vector<8x1xf32>
    %cst_43 = arith.constant 3.200000e+01 : f32
    %85 = vector.broadcast %cst_43 : f32 to vector<8x1xf32>
    %86 = arith.divf %84, %85 : vector<8x1xf32>
    %87 = vector.broadcast %86 : vector<8x1xf32> to vector<8x32xf32>
    %88 = arith.subf %82, %87 : vector<8x32xf32>
    %89 = arith.mulf %88, %88 : vector<8x32xf32>
    %cst_44 = arith.constant dense<0.000000e+00> : vector<8xf32>
    %90 = vector.multi_reduction <add>, %89, %cst_44 [1] : vector<8x32xf32> to vector<8xf32>
    %91 = vector.shape_cast %90 : vector<8xf32> to vector<8x1xf32>
    %cst_45 = arith.constant 3.200000e+01 : f32
    %92 = vector.broadcast %cst_45 : f32 to vector<8x1xf32>
    %93 = arith.divf %91, %92 : vector<8x1xf32>
    %94 = vector.broadcast %86 : vector<8x1xf32> to vector<8x32xf32>
    %95 = arith.subf %82, %94 : vector<8x32xf32>
    %cst_46 = arith.constant 9.99999974E-6 : f32
    %96 = vector.broadcast %cst_46 : f32 to vector<8x1xf32>
    %97 = arith.addf %93, %96 : vector<8x1xf32>
    %98 = math.rsqrt %97 : vector<8x1xf32>
    %99 = vector.broadcast %98 : vector<8x1xf32> to vector<8x32xf32>
    %100 = arith.mulf %95, %99 : vector<8x32xf32>
    %c0_47 = arith.constant 0 : index
    %c0_48 = arith.constant 0 : index
    %101 = vector.load %arg9[%c0_47, %c0_48] : memref<1x32xf32, #tpu.memory_space<vmem>>, vector<1x32xf32>
    %102 = vector.shape_cast %101 : vector<1x32xf32> to vector<32xf32>
    %103 = vector.shape_cast %102 : vector<32xf32> to vector<1x32xf32>
    %104 = vector.broadcast %103 : vector<1x32xf32> to vector<8x32xf32>
    %105 = arith.mulf %100, %104 : vector<8x32xf32>
    %c0_49 = arith.constant 0 : index
    %c0_50 = arith.constant 0 : index
    %106 = vector.load %arg10[%c0_49, %c0_50] : memref<1x32xf32, #tpu.memory_space<vmem>>, vector<1x32xf32>
    %107 = vector.shape_cast %106 : vector<1x32xf32> to vector<32xf32>
    %108 = vector.shape_cast %107 : vector<32xf32> to vector<1x32xf32>
    %109 = vector.broadcast %108 : vector<1x32xf32> to vector<8x32xf32>
    %110 = arith.addf %105, %109 : vector<8x32xf32>
    %c0_51 = arith.constant 0 : index
    %c0_52 = arith.constant 0 : index
    %c0_53 = arith.constant 0 : index
    %111 = vector.load %arg11[%c0_51, %c0_52, %c0_53] : memref<1x8x32xf32, #tpu.memory_space<vmem>>, vector<1x8x32xf32>
    %112 = vector.shape_cast %111 : vector<1x8x32xf32> to vector<8x32xf32>
    %113 = vector.shape_cast %110 : vector<8x32xf32> to vector<1x8x32xf32>
    tpu.vector_store %arg11[%c0_51, %c0_52, %c0_53], %113 {strides = array<i32>} : memref<1x8x32xf32, #tpu.memory_space<vmem>>, vector<1x8x32xf32>,
    return
  }
  func.func @transform_0(%arg0: i32, %arg1: i32) -> (i32, i32, i32) {
    %c0_i32 = arith.constant 0 : i32
    %c0_i32_0 = arith.constant 0 : i32
    return %arg0, %arg1, %c0_i32 : i32, i32, i32
  }
  func.func @transform_1(%arg0: i32, %arg1: i32) -> (i32, i32, i32) {
    %c0_i32 = arith.constant 0 : i32
    %c0_i32_0 = arith.constant 0 : i32
    %c0_i32_1 = arith.constant 0 : i32
    return %arg0, %c0_i32, %c0_i32_0 : i32, i32, i32
  }
  func.func @transform_2(%arg0: i32, %arg1: i32) -> (i32, i32, i32) {
    %c0_i32 = arith.constant 0 : i32
    %c0_i32_0 = arith.constant 0 : i32
    %c0_i32_1 = arith.constant 0 : i32
    return %arg0, %c0_i32, %c0_i32_0 : i32, i32, i32
  }
  func.func @transform_3(%arg0: i32, %arg1: i32) -> (i32, i32, i32) {
    %c0_i32 = arith.constant 0 : i32
    %c0_i32_0 = arith.constant 0 : i32
    %c0_i32_1 = arith.constant 0 : i32
    %c0_i32_2 = arith.constant 0 : i32
    return %c0_i32, %c0_i32_0, %c0_i32_1 : i32, i32, i32
  }
  func.func @transform_4(%arg0: i32, %arg1: i32) -> (i32, i32, i32) {
    %c0_i32 = arith.constant 0 : i32
    %c0_i32_0 = arith.constant 0 : i32
    %c0_i32_1 = arith.constant 0 : i32
    %c0_i32_2 = arith.constant 0 : i32
    return %c0_i32, %c0_i32_0, %c0_i32_1 : i32, i32, i32
  }
  func.func @transform_5(%arg0: i32, %arg1: i32) -> (i32, i32, i32) {
    %c0_i32 = arith.constant 0 : i32
    %c0_i32_0 = arith.constant 0 : i32
    %c0_i32_1 = arith.constant 0 : i32
    %c0_i32_2 = arith.constant 0 : i32
    return %c0_i32, %c0_i32_0, %c0_i32_1 : i32, i32, i32
  }
  func.func @transform_6(%arg0: i32, %arg1: i32) -> (i32, i32) {
    %c0_i32 = arith.constant 0 : i32
    %c0_i32_0 = arith.constant 0 : i32
    %c0_i32_1 = arith.constant 0 : i32
    return %c0_i32, %c0_i32_0 : i32, i32
  }
  func.func @transform_7(%arg0: i32, %arg1: i32) -> (i32, i32) {
    %c0_i32 = arith.constant 0 : i32
    %c0_i32_0 = arith.constant 0 : i32
    %c0_i32_1 = arith.constant 0 : i32
    return %c0_i32, %c0_i32_0 : i32, i32
  }
  func.func @transform_8(%arg0: i32, %arg1: i32) -> (i32, i32) {
    %c0_i32 = arith.constant 0 : i32
    %c0_i32_0 = arith.constant 0 : i32
    %c0_i32_1 = arith.constant 0 : i32
    return %c0_i32, %c0_i32_0 : i32, i32
  }
  func.func @transform_9(%arg0: i32, %arg1: i32) -> (i32, i32, i32) {
    %c0_i32 = arith.constant 0 : i32
    %c0_i32_0 = arith.constant 0 : i32
    return %arg0, %arg1, %c0_i32 : i32, i32, i32
  }
  func.func @transform_10(%arg0: i32, %arg1: i32) -> (i32, i32, i32, i32) {
    %c0_i32 = arith.constant 0 : i32
    %c0_i32_0 = arith.constant 0 : i32
    %c0_i32_1 = arith.constant 0 : i32
    return %c0_i32, %arg0, %arg1, %c0_i32_0 : i32, i32, i32, i32
  }
}

</mosaic_0001>

<bundles_post_ra>
// kernel: tpu_custom_call.1
= control target key start
LH: loop header
LB: loop body
LE: loop exit
PB: predicated region body
PF: predicated region fallthrough
CT: control target
= control target key end

     0   :  { %s1564_s0 = inlined_call_operand.vmem [shape: f32[2,16,32], index: 0, kind: input, shape index: {}]   ;;  %s1565_s1 = inlined_call_operand.vmem [shape: f32[4,8,16], index: 1, kind: input, shape index: {}]   ;;  %s1566_s2 = inlined_call_operand.vmem [shape: f32[4,8,16], index: 2, kind: input, shape index: {}]   ;;  %s1567_s3 = inlined_call_operand.vmem [shape: f32[2,32,16], index: 3, kind: input, shape index: {}]   ;;  %s1568_s4 = inlined_call_operand.vmem [shape: f32[2,1,16], index: 4, kind: input, shape index: {}]   ;;  %s1569_s5 = inlined_call_operand.hbm [shape: f32[2,16,32], index: 5, kind: input, shape index: {}]   ;;  %s1570_s6 = inlined_call_operand.vmem [shape: f32[1,32], index: 6, kind: input, shape index: {}]   ;;  %s1571_s7 = inlined_call_operand.vmem [shape: f32[1,32], index: 7, kind: input, shape index: {}]   ;;  %s1572_s8 = inlined_call_operand.vmem [shape: f32[1,32], index: 8, kind: input, shape index: {}]   ;;  %s1573_s9 = inlined_call_operand.hbm [shape: f32[2,16,32], index: 9, kind: output, shape index: {0}]   ;;  %s1574_s10 = inlined_call_operand.vmem [shape: f32[2,2,16,8], index: 10, kind: output, shape index: {1}]  }
   0x1   :  { %1580 = sst [smem:[#allocation15_spill]] %s1569_s5 }
   0x2   :  { %16 = vsyncpa [#allocation3], 0 }
   0x3   :  { %17 = vsyncpa [#allocation4], 0 }
   0x4   :  { %19 = vsyncpa [#allocation4 + $0x1], 0  ;;  %s1312_s13 = smov 0   ;;  %s1314_s14 = smov 0  }
   0x5   :  { %s1316_s15 = smov 0   ;;  %s1318_s16 = smov 0  }
   0x6   :  { %s1320_s17 = smov 0   ;;  %s1322_s18 = smov 0  }
   0x7   :  { %s1324_s19 = smov 0   ;;  %s1326_s20 = smov 0  }
   0x8 LB: > { %1581 = sst [smem:[#allocation9_spill]] %s1243_s18  ;;  %s980_s21 = sadd.s32 4294967295, %s1251_s20   ;;  %s1251_s20 = sphi %s1326_s20, %s25_s20   ;;  %s1247_s19 = sphi %s1324_s19, %s1597_s19   ;;  %s1243_s18 = sphi %s1322_s18, %s1596_s18   ;;  %s1239_s17 = sphi %s1320_s17, %s1595_s17   ;;  %s1235_s16 = sphi %s1318_s16, %s1594_s16   ;;  %s1231_s15 = sphi %s1316_s15, %s1600_s15   ;;  %s1227_s14 = sphi %s1314_s14, %s1599_s14   ;;  %s1223_s13 = sphi %s1312_s13, %s1598_s13  }
   0x9   : > { %1582 = sst [smem:[#allocation10_spill]] %s1247_s19  ;;  %s981_s22 = sadd.s32 4294967294, %s1251_s20  }
   0xa   : > { %s34_s23 = sadd.s32 1, %s1243_s18  ;;  %s37_s24 = sadd.s32 1, %s1247_s19 }
   0xb   : > { %p35_p0 = scmp.ge.s32.totalorder %s34_s23, 2  ;;  %s252_s25 = sadd.s32 1, %s1231_s15 }
   0xc   : > { %p262_p1 = scmp.ne.s32.totalorder %s1231_s15, %s1227_s14  ;;  %p263_p2 = scmp.eq.s32.totalorder %s980_s21, 3 }
   0xd   : > { %s1602_s23 = smov (%p35_p0, %s34_s23), 0  ;;  %s1604_s24 = smov (!%p35_p0, %s37_s24), %s1247_s19 }
   0xe   : > { %1583 = sst [smem:[#allocation11_spill]] %s1602_s23  ;;  %s248_s26 = ssub.s32 %s1243_s18, %s1602_s23 }
   0xf   : > { %p1364_p3 = por %p263_p2, %p262_p1  ;;  %p39_p4 = scmp.ge.s32.totalorder %s1604_s24, 2 }
  0x10   : > { %p268_p5 = scmp.ne.s32.totalorder %s1227_s14, %s1223_s13  ;;  %p269_p6 = scmp.eq.s32.totalorder %s981_s22, 3 }
  0x11   : > { %p982_p7 = scmp.ge.s32.totalorder %s1251_s20, 1  ;;  %s1606_s24 = smov (%p39_p4, %s1604_s24), 0 }
  0x12   : > { %1585 = sst [smem:[#allocation12_spill]] %s1606_s24  ;;  %p1373_p8 = por %p269_p6, %p268_p5 }
  0x13   : > { %p304_p9 = scmp.lt.s32.totalorder %s1251_s20, 5  ;;  %s247_s29 = ssub.s32 %s1247_s19, %s1606_s24 }
  0x14   : > { %s1586_s28 = scalar_select %p1373_p8, 1, 0 }
  0x15   : > { %s249_s30 = sor.u32 %s248_s26, %s247_s29  ;;  %p1380_p10 = pnand %p982_p7, %p304_p9 }
  0x16   : > { %1587 = sst [smem:[#allocation13_spill]] %s1586_s28  ;;  %p250_p11 = scmp.eq.s32.totalorder %s249_s30, 0 }
  0x17   : > { %p1384_p12 = scmp.eq.s32.totalorder %s980_s21, 0  ;;  %p1027_p13 = pneg %p1380_p10 }
  0x18   : > { %s1590_s5 = sld [smem:[#allocation15_spill]]  ;;  %s1253_s26 = smov [#allocation2]  }
  0x19   : > { %s1394_s28 = scalar_select %p250_p11, %s1231_s15, %s252_s25  }
  0x1a   : > { %s323_s29 = sshll.u32 %s1253_s26, 4  ;;  %p1028_p0 = pnand %p1384_p12, %p1027_p13  ;;  %s324_s29 = int_to_ptr.vmem [resolvable:$true] %s323_s29 }
  0x1b   : > { %1591 = sst [smem:[#allocation14_spill]] %s1394_s28  ;;  %s1254_s30 = smov 128  }
  0x1c   : > { %s1255_s21 = smov 8   ;;  %377 = sbr.rel (%p1380_p10) target bundleno = 1499 (0x5db), region = 56 }
  0x1e   : > { %s321_s18 = sshll.u32 %s1590_s5, 4  ;;  %s322_s18 = int_to_ptr.hbm [resolvable:$true] %s321_s18 }
  0x1f   : > { %1030 = dma.hbm_to_vmem [thread:$0]  (!%p1028_p0), %s322_s18, 512, %s324_s29, [#allocation3], %s1254_s30, %s1254_s30, %s1255_s21  }
  0x21   : > { %1214 = dma.done.wait (%p1384_p12), [#allocation3], 512  }
  0x22   : > { %1216 = vsyncadd (%p1384_p12), [#allocation3], 4294966784  ;;  %p433_p1 = scmp.lt.s32.totalorder %s1239_s17, 1  ;;  %p435_p2 = scmp.lt.s32.totalorder %s1235_s16, 1  ;;  %v457_v0 = vld [vmem:[%s1567_s3 + $0x18] sm:$0xff]  ;;  %v456_v1 = vld [vmem:[%s1567_s3 + $0x10] sm:$0xff] }
  0x23   : > { %478 = vmatpush.msra.mxu0 %v457_v0  ;;  %v455_v2 = vld [vmem:[%s1567_s3 + $0x8] sm:$0xff]  ;;  %v454_v3 = vld [vmem:[%s1567_s3] sm:$0xff]  ;;  %vm462_vm0 = vcmask 261120   ;;  %vm488_vm1 = vcmask 130048   ;;  %vm515_vm2 = vcmask 64512   ;;  %v1002_v11 = vld [vmem:[%s1567_s3 + $0x38] sm:$0xff] }
  0x24   : > { %s434_s23 = scalar_select %p433_p1, %s1239_s17, 1  ;;  %v1106_v6 = vld [vmem:[%s1568_s4] ss:$0 sm:$0xff]  ;;  %v1001_v12 = vld [vmem:[%s1567_s3 + $0x30] sm:$0xff]  ;;  %588 = vmatpush.msra.mxu3 %v1002_v11  ;;  %v1000_v13 = vld [vmem:[%s1567_s3 + $0x28] sm:$0xff] }
  0x25   : > { %s436_s25 = scalar_select %p435_p2, %s1235_s16, 1  ;;  %479 = vmatpush.msra.mxu0 %v456_v1  ;;  %v999_v14 = vld [vmem:[%s1567_s3 + $0x20] sm:$0xff]  ;;  %v565_v22 = vld [vmem:[#allocation2 + $0x8] sm:$0xff]  ;;  %v677_v48 = vld [vmem:[#allocation2 + $0x18] sm:$0xff] }
  0x26   : > { %s989_s22 = sshll.u32 %s434_s23, 1  ;;  %589 = vmatpush.msra.mxu3 %v1001_v12  ;;  %v1107_v35 = vld [vmem:[%s1568_s4 + $0x1] ss:$0 sm:$0xff]  ;;  %v676_v49 = vld [vmem:[#allocation2 + $0x10] sm:$0xff]  ;;  %v1108_v63 = vld [vmem:[%s1570_s6] ss:$0 sm:$0xff] }
  0x27   : > { %s438_s18 = sadd.s32 %s989_s22, %s436_s25  ;;  %480 = vmatpush.msra.mxu0 %v455_v2  ;;  %s1428_s22 = sshll.u32 %s1239_s17, 1  ;;  %v564_v38 = vld [vmem:[#allocation2] sm:$0xff] }
  0x28   : > { %s990_s26 = sshll.u32 %s438_s18, 3  ;;  %p442_p4 = scmp.lt.s32.totalorder %s1428_s22, 3  ;;  %590 = vmatpush.msra.mxu3 %v1000_v13 }
  0x29   : > { %s440_s28 = scalar_lea.vmem %s1564_s0, %s990_s26  ;;  %481 = vmatpush.msra.mxu0 %v454_v3  ;;  %s785_s12 = sadd.s32 %s1235_s16, %s1428_s22 }
  0x2a   : > { %v1423_v4 = vld [vmem:[%s440_s28] sm:$0xff]  ;;  %s1432_s5 = scalar_select %p442_p4, %s1428_s22, 3  ;;  %591 = vmatpush.msra.mxu3 %v999_v14 }
  0x2b   : > { %995 = vmatmul.msk.f32.vlgmr.msra.gmra.mxu0 %vm462_vm0, %v1423_v4  ;;  %1004 = vmatmul.msk.f32.vlgmr.msra.gmra.mxu3 %vm462_vm0, %v1423_v4  ;;  %s1504_s25 = sshll.u32 %s785_s12, 3 }
  0x2c   : > { %s992_s19 = sshll.u32 %s1432_s5, 3  ;;  %718 = vmatpush.msrb.mxu3 %v565_v22  ;;  %s1475_s5 = sand.u32 1, %s1227_s14   ;;  %695 = vmatpush.msrb.mxu0 %v677_v48 }
  0x2d   : > { %s1440_s28 = scalar_lea.vmem %s1565_s1, %s992_s19  ;;  %s1469_s26 = scalar_lea.vmem %s1566_s2, %s992_s19 }
  0x2e   : > { %v486_v5 = vld [vmem:[%s1440_s28] sm:$0xff]  ;;  %v1005_v21 = vld [vmem:[%s1440_s28 + $0x8] sm:$0xff]  ;;  %s988_s19 = sshll.u32 %s1475_s5, 4  ;;  %719 = vmatpush.msrb.mxu3 %v564_v38  ;;  %696 = vmatpush.msrb.mxu0 %v676_v49  ;;  %s987_s23 = sshll.u32 %s1475_s5, 3 }
  0x2f   : > { %996 = vmatpush.xpose.msk.msra.mxu1 %vm488_vm1, %v486_v5  ;;  %v487_v20 = vld [vmem:[%s1469_s26] sm:$0xff]  ;;  %s1482_s29 = scalar_lea.vmem [#allocation6], %s988_s19  ;;  %v1006_v47 = vld [vmem:[%s1469_s26 + $0x8] sm:$0xff]  ;;  %s787_s19 = scalar_lea.hbm %s1573_s9, %s1504_s25 }
  0x30   : > { %559 = vmatpush.msra.mxu2 %v487_v20  ;;  %s426_s28 = scalar_lea.vmem [#allocation5], %s987_s23  ;;  %s791_s30 = sshll.u32 %s787_s19, 4  ;;  %s792_s30 = int_to_ptr.hbm [resolvable:$true] %s791_s30 }
  0x31   : > { %s789_s11 = sshll.u32 %s426_s28, 4  ;;  %s771_s21 = scalar_lea.sflag [#allocation4], %s1475_s5  ;;  %s790_s11 = int_to_ptr.vmem [resolvable:$true] %s789_s11 }
  0x32   : > { %1007 = vmatpush.xpose.msk.msrb.mxu2 %vm488_vm1, %v1005_v21  ;;  %s1167_s12 = sshra.s32 %s792_s30, 4  ;;  %s1173_s23 = scalar_lea.hbm %s1573_s9, 32  ;;  %s1168_s12 = int_to_ptr.hbm [resolvable:$true] %s1167_s12 }
  0x33   : > { %670 = vmatpush.msrb.mxu1 %v1006_v47  ;;  %s1169_s24 = scalar_lea.hbm %s1168_s12, 8  ;;  %p1174_p9 = scmp.lt.s32.totalorder %s1168_s12, %s1573_s9 }
  0x34   : > { %p1170_p5 = scmp.ne.s32.totalorder %s1168_s12, %s1169_s24  ;;  %p1175_p10 = scmp.lt.s32.totalorder %s1173_s23, %s1169_s24 }
  0x36   : > { %p1171_p6 = pnand %p1170_p5, %p1364_p3  ;;  %p1176_p11 = por %p1175_p10, %p1174_p9 }
  0x38   : > { %p1172_p7 = pneg %p1171_p6 }
  0x3a   : > { %p1177_p12 = pnand %p1176_p11, %p1172_p7 }
  0xa8   : > { %v483_v7 = vpop.f32.mrf.mxu0 }
  0xa9   : > { %v484_v8 = vadd.f32 %v1106_v6, %v483_v7  ;;  %v1256_v7 = vmov 32.0  }
  0xab   : > { %997 = vmatmul.msk.f32.vlgmr.msra.gmra.mxu1 %vm488_vm1, %v484_v8 }
  0xae   : > { %v593_v36 = vpop.f32.mrf.mxu3 }
  0xaf   : > { %v594_v37 = vadd.f32 %v1107_v35, %v593_v36 }
 0x128   : > { %v512_v9 = vpop.f32.mrf.mxu1 }
 0x129   : > { %v516_v10 = vsel %vm515_vm2, %v512_v9, -inf }
 0x12a   : > { %517 = vmax.xlane.f32.xlu0 %v516_v10 }
 0x19d   : > { %v518_v15 = vpop.xlane.xlu0 %517 }
 0x19e   : > { %v519_v16 = vsub.f32 %v512_v9, %v518_v15 }
 0x1a0   : > { %v520_v17 = vmul.f32 1.442695, %v519_v16 }
 0x1a2   : > { %1111 = vpow2.f32 %v520_v17 }
 0x1a8   : > { %v1112_v18 = vpop.eup %1111 }
 0x1a9   : > { %v522_v19 = vsel %vm515_vm2, %v1112_v18, 0.0 }
 0x1aa   : > { %523 = vadd.xlane.f32.xlu0 %v522_v19 }
 0x21d   : > { %v524_v23 = vpop.xlane.xlu0 %523 }
 0x21e   : > { %1113 = vrcp.f32 %v524_v23  ;;  %v536_v27 = vand.u32 2147483648, %v524_v23  ;;  %v534_v29 = vand.u32 2147483647, %v524_v23  ;;  %vm530_vm4 = vweird.f32 %v524_v23 }
 0x220   : > { %v537_v31 = vor.u32 1.1754944e-38, %v536_v27  ;;  %vm535_vm6 = vcmp.eq.f32.partialorder %v534_v29, 8.507059e+37  ;;  %v1109_v27 = vld [vmem:[%s1571_s7] ss:$0 sm:$0xff] }
 0x224   : > { %v1114_v24 = vpop.eup %1113 }
 0x225   : > { %v526_v25 = vmul.f32 %v1114_v24, %v524_v23  ;;  %vm531_vm3 = vweird.f32 %v1114_v24 }
 0x226   : > { %vm532_vm5 = vmor %vm530_vm4, %vm531_vm3 }
 0x227   : > { %v527_v26 = vsub.f32 1.0, %v526_v25 }
 0x229   : > { %v528_v28 = vmul.f32 %v1114_v24, %v527_v26 }
 0x22b   : > { %v529_v30 = vadd.f32 %v1114_v24, %v528_v28 }
 0x22d   : > { %v533_v32 = vsel %vm532_vm5, %v1114_v24, %v529_v30  ;;  %v1110_v30 = vld [vmem:[%s1572_s8] ss:$0 sm:$0xff] }
 0x22e   : > { %v538_v33 = vsel %vm535_vm6, %v537_v31, %v533_v32 }
 0x22f   : > { %v539_v34 = vmul.f32 %v1112_v18, %v538_v33 }
 0x231   : > { %998 = vmatmul.msk.f32.vlgmr.msra.gmra.mxu2 %vm515_vm2, %v539_v34  ;;  %540 = vst.msk [vmem:[%s1482_s29] sm:$0xff] %vm515_vm2, %v539_v34 }
 0x239   : > { %1008 = vmatmul.msk.f32.vlgmr.msrb.gmra.mxu2 %vm488_vm1, %v594_v37 }
 0x2b4   : > { %v561_v39 = vpop.f32.mrf.mxu2 }
 0x2b5   : > { %1012 = vmatmul.msk.f32.vlgmr.msrb.gmra.mxu3 %vm488_vm1, %v561_v39 }
 0x2bc   : > { %v623_v40 = vpop.f32.mrf.mxu2 }
 0x2bd   : > { %v626_v41 = vsel %vm515_vm2, %v623_v40, -inf }
 0x2be   : > { %627 = vmax.xlane.f32.xlu1 %v626_v41 }
 0x331   : > { %v628_v42 = vpop.xlane.xlu1 %627 }
 0x332   : > { %v629_v43 = vsub.f32 %v623_v40, %v628_v42 }
 0x334   : > { %v630_v44 = vmul.f32 1.442695, %v629_v43 }
 0x336   : > { %1115 = vpow2.f32 %v630_v44 }
 0x338   : > { %v721_v0 = vpop.f32.mrf.mxu3 }
 0x33c   : > { %v1116_v45 = vpop.eup %1115 }
 0x33d   : > { %v632_v46 = vsel %vm515_vm2, %v1116_v45, 0.0 }
 0x33e   : > { %633 = vadd.xlane.f32.xlu1 %v632_v46 }
 0x3b1   : > { %v634_v50 = vpop.xlane.xlu1 %633 }
 0x3b2   : > { %1117 = vrcp.f32 %v634_v50  ;;  %v646_v54 = vand.u32 2147483648, %v634_v50  ;;  %v644_v56 = vand.u32 2147483647, %v634_v50  ;;  %vm640_vm8 = vweird.f32 %v634_v50 }
 0x3b3   : > { %1119 = vrcp.f32 %v1256_v7 }
 0x3b4   : > { %v647_v58 = vor.u32 1.1754944e-38, %v646_v54  ;;  %vm645_vm10 = vcmp.eq.f32.partialorder %v644_v56, 8.507059e+37 }
 0x3b8   : > { %v1118_v51 = vpop.eup %1117 }
 0x3b9   : > { %v636_v52 = vmul.f32 %v1118_v51, %v634_v50  ;;  %vm641_vm7 = vweird.f32 %v1118_v51  ;;  %v1120_v8 = vpop.eup %1119 }
 0x3ba   : > { %vm642_vm9 = vmor %vm640_vm8, %vm641_vm7  ;;  %v734_v9 = vmul.f32 32.0, %v1120_v8  ;;  %vm738_vm11 = vweird.f32 %v1120_v8 }
 0x3bb   : > { %v637_v53 = vsub.f32 1.0, %v636_v52 }
 0x3bc   : > { %v735_v10 = vsub.f32 1.0, %v734_v9 }
 0x3bd   : > { %v638_v55 = vmul.f32 %v1118_v51, %v637_v53 }
 0x3be   : > { %v736_v11 = vmul.f32 %v1120_v8, %v735_v10 }
 0x3bf   : > { %v639_v57 = vadd.f32 %v1118_v51, %v638_v55 }
 0x3c0   : > { %v737_v12 = vadd.f32 %v1120_v8, %v736_v11 }
 0x3c1   : > { %v643_v59 = vsel %vm642_vm9, %v1118_v51, %v639_v57 }
 0x3c2   : > { %v648_v60 = vsel %vm645_vm10, %v647_v58, %v643_v59  ;;  %v739_v13 = vsel %vm738_vm11, %v1120_v8, %v737_v12 }
 0x3c3   : > { %v649_v61 = vmul.f32 %v1116_v45, %v648_v60 }
 0x3c5   : > { %1010 = vmatmul.msk.f32.vlgmr.msrb.gmra.mxu1 %vm515_vm2, %v649_v61  ;;  %1009 = vst.msk [vmem:[%s1482_s29 + $0x8] sm:$0xff] %vm515_vm2, %v649_v61 }
 0x442   : > { %v672_v62 = vpop.f32.mrf.mxu1 }
 0x443   : > { %1011 = vmatmul.msk.f32.vlgmr.msrb.gmra.mxu0 %vm488_vm1, %v672_v62 }
 0x4c0   : > { %v698_v1 = vpop.f32.mrf.mxu0 }
 0x4c1   : > { %v722_v2 = vadd.f32 %v721_v0, %v698_v1 }
 0x4c3   : > { %v728_v3 = vadd.f32 %v1108_v63, %v722_v2 }
 0x4c5   : > { %v729_v5 = vadd.f32 %v728_v3, %v1423_v4 }
 0x4c7   : > { %v730_v6 = vsel %vm462_vm0, %v729_v5, 0.0 }
 0x4c8   : > { %731 = vadd.xlane.f32.xlu2 %v730_v6 }
 0x53b   : > { %v732_v14 = vpop.xlane.xlu2 %731 }
 0x53c   : > { %v740_v15 = vmul.f32 %v739_v13, %v732_v14 }
 0x53e   : > { %v741_v16 = vsub.f32 %v729_v5, %v740_v15 }
 0x540   : > { %v742_v17 = vmul.f32 %v741_v16, %v741_v16 }
 0x542   : > { %v743_v4 = vsel %vm462_vm0, %v742_v17, 0.0 }
 0x543   : > { %744 = vadd.xlane.f32.xlu2 %v743_v4 }
 0x5b6   : > { %v745_v18 = vpop.xlane.xlu2 %744 }
 0x5b7   : > { %v746_v19 = vmul.f32 %v745_v18, %v739_v13 }
 0x5b9   : > { %v747_v20 = vadd.f32 1e-05, %v746_v19 }
 0x5bb   : > { %1121 = vrsqrt.f32 %v747_v20  ;;  %vm754_vm13 = vweird.f32 %v747_v20 }
 0x5c1   : > { %v1122_v21 = vpop.eup %1121 }
 0x5c2   : > { %v749_v22 = vmul.f32 %v1122_v21, %v747_v20  ;;  %vm755_vm12 = vweird.f32 %v1122_v21 }
 0x5c3   : > { %vm756_vm14 = vmor %vm754_vm13, %vm755_vm12 }
 0x5c4   : > { %v750_v23 = vmul.f32 %v1122_v21, %v749_v22 }
 0x5c6   : > { %v751_v24 = vmul.f32 0.5, %v750_v23 }
 0x5c8   : > { %v752_v25 = vsub.f32 1.5, %v751_v24 }
 0x5ca   : > { %v753_v26 = vmul.f32 %v1122_v21, %v752_v25 }
 0x5cc   : > { %v757_v28 = vsel %vm756_vm14, %v1122_v21, %v753_v26 }
 0x5cd   : > { %v758_v29 = vmul.f32 %v757_v28, %v741_v16 }
 0x5cf   : > { %v763_v31 = vmul.f32 %v1109_v27, %v758_v29 }
 0x5d1   : > { %v768_v32 = vadd.f32 %v1110_v30, %v763_v31 }
 0x5d3   : > { %769 = vst.msk [vmem:[%s426_s28] sm:$0xff] %vm462_vm0, %v768_v32 }
 0x5d4   : > { %1180 = shalt.err (!%p1177_p12)
}
 0x5d5   : > { %1025 = dma.vmem_to_hbm [thread:$0]  (%p1364_p3), %s790_s11, 128, %s792_s30, %s771_s21   ;;  %v832_v33 = vld [vmem:[%s1482_s29] sm:$0xff] (%p1364_p3)  ;;  %v834_v34 = vld [vmem:[%s1482_s29 + $0x8] sm:$0xff] (%p1364_p3) }
 0x5d6   : > { %797 = sbr.rel (!%p1364_p3) target bundleno = 1499 (0x5db), region = 68  ;;  %s801_s22 = scalar_lea.vmem (%p1364_p3), %s1574_s10, %s1504_s25 }
 0x5d7   : > { %833 = vst [vmem:[%s801_s22] sm:$0xff] (%p1364_p3), %v832_v33 }
 0x5d8   : > { %835 = vst [vmem:[%s801_s22 + $0x20] sm:$0xff] (%p1364_p3), %v834_v34 }
 0x5db PF: > { %p1037_p13 = scmp.ge.s32.totalorder %s1251_s20, 2  ;;  %s847_s11 = sand.u32 1, %s1223_s13  }
 0x5dc   : > { %s848_s27 = scalar_lea.sflag [#allocation4], %s847_s11 }
 0x5dd   : > { %p1032_p3 = pnand %p1037_p13, %p1373_p8 }
 0x5df   : > { %p1033_p0 = pneg %p1032_p3 }
 0x5e1   : > { %1218 = dma.done.wait (%p1033_p0), %s848_s27, 128  }
 0x5e2   : > { %1220 = vsyncadd (%p1033_p0), %s848_s27, 4294967168  ;;  %s25_s20 = sadd.s32 1, %s1251_s20   ;;  %s1593_s29 = sld [smem:[#allocation14_spill]] }
 0x5e3   : > { %p22_p1 = scmp.ge.s32.totalorder %s25_s20, 6   ;;  %s1594_s16 = sld [smem:[#allocation9_spill]] }
 0x5e4   : > { %s1595_s17 = sld [smem:[#allocation10_spill]]  ;;  %s1598_s13 = smov %s1227_s14 }
 0x5e5   : > { %s1596_s18 = sld [smem:[#allocation11_spill]]  ;;  %s1599_s14 = smov %s1231_s15 }
 0x5e6   : > { %s1597_s19 = sld [smem:[#allocation12_spill]]  ;;  %24 = sbr.rel (!%p22_p1) target bundleno = 8 (0x8), region = 158 }
 0x5e8   : > { %s1600_s15 = smov %s1593_s29 }
 0x5eb   :  { %861 = vsyncpa [#allocation3], 1 }
 0x5ec   :  { %863 = vsyncpa [#allocation3 + $0x1], 1 }
 0x5ed   :  { %864 = vsyncpa [#allocation4], 1 }
 0x5ee   :  { %866 = vsyncpa [#allocation4 + $0x1], 1 }

</bundles_post_ra>
